<compile_context>
chip_gen: v7x
topology: tpu7x:2x2x1
jax: 0.10.0
libtpu: 0.0.40
codegen_flags: <defaults>
</compile_context>

<pallas_src>
import functools
import math

import jax
import jax.numpy as jnp
from jax.experimental import pallas as pl
from jax.experimental.pallas import tpu as pltpu


def _round_up(n, m):
    return ((n + m - 1) // m) * m


def _policy_kernel(x_ref, eps_ref, w_ref, b_ref, out_ref, *,
                   obs_p, lat_p, out_p, act_dim):
    x = x_ref[...]                                            # (TB, obs_p), zero-padded obs

    # Static, 128-aligned views into the packed weight / bias slabs.
    w1 = w_ref[0:obs_p, 0:lat_p]                              # fused [W1p | W1v]
    w2 = w_ref[obs_p:obs_p + lat_p, 0:lat_p]                  # block-diag [W2p 0; 0 W2v]
    w3 = w_ref[obs_p + lat_p:obs_p + 2 * lat_p, 0:out_p]      # fused heads [Wa | Wv | 0]

    b1 = b_ref[0:1, 0:lat_p]
    b2 = b_ref[1:2, 0:lat_p]
    b3 = b_ref[2:3, 0:out_p]
    log_std = b_ref[3:4, 0:out_p]                             # 0 outside the act_dim lanes

    # Fused actor+critic trunk: every matmul is lane-full (N >= 128).
    h = jnp.tanh(jnp.dot(x, w1, preferred_element_type=jnp.float32) + b1)
    latent = jnp.tanh(jnp.dot(h, w2, preferred_element_type=jnp.float32) + b2)
    head = jnp.dot(latent, w3, preferred_element_type=jnp.float32) + b3
    # head lanes: [mean(act_dim) | value(1) | 0 ...]

    eps = eps_ref[...]                                        # (TB, out_p), 0 outside act lanes
    std = jnp.exp(log_std)                                    # == 1.0 outside act lanes
    slab = head + std * eps                                   # [actions | value | 0 ...]

    # log-prob of sampled actions, computed directly from eps (z == eps).
    lane = jax.lax.broadcasted_iota(jnp.int32, slab.shape, 1)
    act_mask = (lane < act_dim).astype(jnp.float32)
    logp_elem = (-0.5 * eps * eps - log_std
                 - 0.5 * jnp.log(2.0 * jnp.pi)) * act_mask
    logp = jnp.sum(logp_elem, axis=-1, keepdims=True)         # (TB, 1)

    # Lane-dense output slab: [actions | value | log_prob | pad].
    out_ref[...] = jnp.where(lane == act_dim + 1, logp, slab)


def _pack_params(params, obs_dim, obs_p, lat_p, out_p):
    """Pack all weights/biases into one weight slab and one bias slab."""
    hid = params["W1p"].shape[1]
    act = params["Wa"].shape[1]
    wpad = max(lat_p, out_p)

    w = jnp.zeros((obs_p + 2 * lat_p, wpad), jnp.float32)
    # layer 1: [W1p | W1v], zero-padded rows beyond obs_dim
    w = w.at[:obs_dim, :hid].set(params["W1p"])
    w = w.at[:obs_dim, hid:2 * hid].set(params["W1v"])
    # layer 2: block diagonal
    w = w.at[obs_p:obs_p + hid, :hid].set(params["W2p"])
    w = w.at[obs_p + hid:obs_p + 2 * hid, hid:2 * hid].set(params["W2v"])
    # heads: mean from latent_pi rows, value from latent_vf rows
    w = w.at[obs_p + lat_p:obs_p + lat_p + hid, :act].set(params["Wa"])
    w = w.at[obs_p + lat_p + hid:obs_p + lat_p + 2 * hid, act:act + 1].set(params["Wv"])

    b = jnp.zeros((8, wpad), jnp.float32)
    b = b.at[0, :hid].set(params["b1p"][0])
    b = b.at[0, hid:2 * hid].set(params["b1v"][0])
    b = b.at[1, :hid].set(params["b2p"][0])
    b = b.at[1, hid:2 * hid].set(params["b2v"][0])
    b = b.at[2, :act].set(params["ba"][0])
    b = b.at[2, act:act + 1].set(params["bv"][0])
    b = b.at[3, :act].set(params["log_std"][0])
    return w, b


def policy_forward(x, params, noise, *, tile_b=512):
    """SB3 policy.forward(x, deterministic=False) -> (actions, values, log_prob)."""
    B, obs_dim = x.shape
    hid = params["W1p"].shape[1]
    act_dim = params["Wa"].shape[1]

    obs_p = _round_up(obs_dim, 128)
    lat_p = _round_up(2 * hid, 128)
    out_p = _round_up(act_dim + 2, 128)
    wpad = max(lat_p, out_p)

    tb = min(tile_b, _round_up(B, 8))
    b_pad = _round_up(B, tb)
    n_tiles = b_pad // tb

    # Lane/sublane-padded inputs (zeros outside the real data).
    x_p = jnp.zeros((b_pad, obs_p), jnp.float32).at[:B, :obs_dim].set(x)
    eps_p = jnp.zeros((b_pad, out_p), jnp.float32).at[:B, :act_dim].set(noise)

    w_slab, b_slab = _pack_params(params, obs_dim, obs_p, lat_p, out_p)

    kernel = functools.partial(_policy_kernel, obs_p=obs_p, lat_p=lat_p,
                               out_p=out_p, act_dim=act_dim)

    flops = 2 * b_pad * (obs_p * lat_p + lat_p * lat_p + lat_p * out_p)
    transcendentals = b_pad * (2 * lat_p + out_p)
    bytes_accessed = 4 * (x_p.size + eps_p.size + w_slab.size + b_slab.size
                          + b_pad * out_p)

    slab = pl.pallas_call(
        kernel,
        out_shape=jax.ShapeDtypeStruct((b_pad, out_p), jnp.float32),
        grid=(n_tiles,),
        in_specs=[
            pl.BlockSpec((tb, obs_p), lambda i: (i, 0)),               # x tile
            pl.BlockSpec((tb, out_p), lambda i: (i, 0)),               # noise tile
            pl.BlockSpec((obs_p + 2 * lat_p, wpad), lambda i: (0, 0)),  # resident weights
            pl.BlockSpec((8, wpad), lambda i: (0, 0)),                  # resident biases
        ],
        out_specs=pl.BlockSpec((tb, out_p), lambda i: (i, 0)),
        compiler_params=pltpu.CompilerParams(
            dimension_semantics=("parallel",)),
        cost_estimate=pl.CostEstimate(flops=flops,
                                      transcendentals=transcendentals,
                                      bytes_accessed=bytes_accessed),
    )(x_p, eps_p, w_slab, b_slab)

    actions = slab[:B, :act_dim]
    values = slab[:B, act_dim:act_dim + 1]
    log_prob = slab[:B, act_dim + 1]          # SB3 returns (B,)
    return actions, values, log_prob


def init_params(key, obs_dim, hidden, act_dim):
    """Deterministic synthetic parameters (SB3-style MLP policy shapes)."""
    ks = jax.random.split(key, 6)

    def dense(k, fan_in, fan_out):
        scale = 1.0 / math.sqrt(fan_in)
        return jax.random.uniform(k, (fan_in, fan_out), jnp.float32, -scale, scale)

    return {
        "W1p": dense(ks[0], obs_dim, hidden), "b1p": jnp.zeros((1, hidden), jnp.float32),
        "W2p": dense(ks[1], hidden, hidden),  "b2p": jnp.zeros((1, hidden), jnp.float32),
        "W1v": dense(ks[2], obs_dim, hidden), "b1v": jnp.zeros((1, hidden), jnp.float32),
        "W2v": dense(ks[3], hidden, hidden),  "b2v": jnp.zeros((1, hidden), jnp.float32),
        "Wa":  dense(ks[4], hidden, act_dim), "ba": jnp.zeros((1, act_dim), jnp.float32),
        "Wv":  dense(ks[5], hidden, 1),       "bv": jnp.zeros((1, 1), jnp.float32),
        "log_std": jnp.zeros((1, act_dim), jnp.float32),
    }


if __name__ == "__main__":
    B, OBS, HID, ACT = 8, 16, 64, 4

    key = jax.random.PRNGKey(0)
    k_obs, k_params, k_noise = jax.random.split(key, 3)

    x = jax.random.normal(k_obs, (B, OBS), jnp.float32)
    params = init_params(k_params, OBS, HID, ACT)
    # deterministic=False -> sample; noise generated in plain JAX (glue), scaled in-kernel.
    noise = jax.random.normal(k_noise, (B, ACT), jnp.float32)

    actions, values, log_prob = jax.block_until_ready(
        policy_forward(x, params, noise))

    # pure-JAX reference (unfused)
    h_pi = jnp.tanh(x @ params["W1p"] + params["b1p"])
    latent_pi = jnp.tanh(h_pi @ params["W2p"] + params["b2p"])
    h_vf = jnp.tanh(x @ params["W1v"] + params["b1v"])
    latent_vf = jnp.tanh(h_vf @ params["W2v"] + params["b2v"])
    mean_ref = latent_pi @ params["Wa"] + params["ba"]
    val_ref = latent_vf @ params["Wv"] + params["bv"]
    act_ref = mean_ref + jnp.exp(params["log_std"]) * noise
    logp_ref = jnp.sum(-0.5 * noise * noise - params["log_std"]
                       - 0.5 * jnp.log(2.0 * jnp.pi), axis=-1)

    assert actions.shape == (B, ACT) and values.shape == (B, 1) and log_prob.shape == (B,)
    assert jnp.allclose(actions, act_ref, atol=1e-4, rtol=1e-4), "actions mismatch"
    assert jnp.allclose(values, val_ref, atol=1e-4, rtol=1e-4), "values mismatch"
    assert jnp.allclose(log_prob, logp_ref, atol=1e-4, rtol=1e-4), "log_prob mismatch"

    print("KERNEL_OK")
</pallas_src>

<mosaic_0001>
module attributes {stable_mosaic.version = 11 : i64} {
  func.func @_policy_kernel(%arg0: i32, %arg1: memref<8x128xf32, #tpu.memory_space<vmem>>, %arg2: memref<8x128xf32, #tpu.memory_space<vmem>>, %arg3: memref<384x128xf32, #tpu.memory_space<vmem>>, %arg4: memref<8x128xf32, #tpu.memory_space<vmem>>, %arg5: memref<8x128xf32, #tpu.memory_space<vmem>>) attributes {dimension_semantics = [#tpu.dimension_semantics<parallel>], iteration_bounds = array<i64: 1>, scalar_prefetch = 0 : i64, scratch_operands = 0 : i64, tpu.core_type = #tpu.core_type<tc>, window_params = [{transform_indices = @transform_0, window_bounds = array<i64: 8, 128>}, {transform_indices = @transform_1, window_bounds = array<i64: 8, 128>}, {pipeline_mode = #tpu.pipeline_mode<synchronous>, transform_indices = @transform_2, window_bounds = array<i64: 384, 128>}, {pipeline_mode = #tpu.pipeline_mode<synchronous>, transform_indices = @transform_3, window_bounds = array<i64: 8, 128>}, {transform_indices = @transform_4, window_bounds = array<i64: 8, 128>}]} {
    %c0 = arith.constant 0 : index
    %c0_0 = arith.constant 0 : index
    %0 = vector.load %arg1[%c0, %c0_0] : memref<8x128xf32, #tpu.memory_space<vmem>>, vector<8x128xf32>
    %c0_1 = arith.constant 0 : index
    %c0_2 = arith.constant 0 : index
    %1 = vector.load %arg3[%c0_1, %c0_2] : memref<384x128xf32, #tpu.memory_space<vmem>>, vector<128x128xf32>
    %c128 = arith.constant 128 : index
    %c0_3 = arith.constant 0 : index
    %2 = vector.load %arg3[%c128, %c0_3] : memref<384x128xf32, #tpu.memory_space<vmem>>, vector<128x128xf32>
    %c256 = arith.constant 256 : index
    %c0_4 = arith.constant 0 : index
    %3 = vector.load %arg3[%c256, %c0_4] : memref<384x128xf32, #tpu.memory_space<vmem>>, vector<128x128xf32>
    %c0_5 = arith.constant 0 : index
    %c0_6 = arith.constant 0 : index
    %4 = vector.load %arg4[%c0_5, %c0_6] : memref<8x128xf32, #tpu.memory_space<vmem>>, vector<1x128xf32>
    %c1 = arith.constant 1 : index
    %c0_7 = arith.constant 0 : index
    %5 = vector.load %arg4[%c1, %c0_7] : memref<8x128xf32, #tpu.memory_space<vmem>>, vector<1x128xf32>
    %c2 = arith.constant 2 : index
    %c0_8 = arith.constant 0 : index
    %6 = vector.load %arg4[%c2, %c0_8] : memref<8x128xf32, #tpu.memory_space<vmem>>, vector<1x128xf32>
    %c3 = arith.constant 3 : index
    %c0_9 = arith.constant 0 : index
    %7 = vector.load %arg4[%c3, %c0_9] : memref<8x128xf32, #tpu.memory_space<vmem>>, vector<1x128xf32>
    %cst = arith.constant dense<0.000000e+00> : vector<8x128xf32>
    %8 = tpu.matmul %0, %1, %cst {dimension_numbers = #tpu.dot_dimension_numbers<[1], [0], [0], [1], [0, 0, 1, 1], [], []>} : vector<8x128xf32>, vector<128x128xf32>, vector<8x128xf32> -> vector<8x128xf32>
    %9 = vector.broadcast %4 : vector<1x128xf32> to vector<8x128xf32>
    %10 = arith.addf %8, %9 : vector<8x128xf32>
    %11 = math.tanh %10 : vector<8x128xf32>
    %cst_10 = arith.constant dense<0.000000e+00> : vector<8x128xf32>
    %12 = tpu.matmul %11, %2, %cst_10 {dimension_numbers = #tpu.dot_dimension_numbers<[1], [0], [0], [1], [0, 0, 1, 1], [], []>} : vector<8x128xf32>, vector<128x128xf32>, vector<8x128xf32> -> vector<8x128xf32>
    %13 = vector.broadcast %5 : vector<1x128xf32> to vector<8x128xf32>
    %14 = arith.addf %12, %13 : vector<8x128xf32>
    %15 = math.tanh %14 : vector<8x128xf32>
    %cst_11 = arith.constant dense<0.000000e+00> : vector<8x128xf32>
    %16 = tpu.matmul %15, %3, %cst_11 {dimension_numbers = #tpu.dot_dimension_numbers<[1], [0], [0], [1], [0, 0, 1, 1], [], []>} : vector<8x128xf32>, vector<128x128xf32>, vector<8x128xf32> -> vector<8x128xf32>
    %17 = vector.broadcast %6 : vector<1x128xf32> to vector<8x128xf32>
    %18 = arith.addf %16, %17 : vector<8x128xf32>
    %c0_12 = arith.constant 0 : index
    %c0_13 = arith.constant 0 : index
    %19 = vector.load %arg2[%c0_12, %c0_13] : memref<8x128xf32, #tpu.memory_space<vmem>>, vector<8x128xf32>
    %20 = math.exp %7 : vector<1x128xf32>
    %21 = vector.broadcast %20 : vector<1x128xf32> to vector<8x128xf32>
    %22 = arith.mulf %21, %19 : vector<8x128xf32>
    %23 = arith.addf %18, %22 : vector<8x128xf32>
    %24 = tpu.iota {dimensions = array<i32: 1>} : vector<8x128xi32>
    %c4_i32 = arith.constant 4 : i32
    %25 = vector.broadcast %c4_i32 : i32 to vector<8x128xi32>
    %26 = arith.cmpi slt, %24, %25 : vector<8x128xi32>
    %27 = arith.extui %26 : vector<8x128xi1> to vector<8x128xi32>
    %28 = arith.sitofp %27 : vector<8x128xi32> to vector<8x128xf32>
    %cst_14 = arith.constant -5.000000e-01 : f32
    %29 = vector.broadcast %cst_14 : f32 to vector<8x128xf32>
    %30 = arith.mulf %29, %19 : vector<8x128xf32>
    %31 = arith.mulf %30, %19 : vector<8x128xf32>
    %32 = vector.broadcast %7 : vector<1x128xf32> to vector<8x128xf32>
    %33 = arith.subf %31, %32 : vector<8x128xf32>
    %cst_15 = arith.constant 6.28318548 : f32
    %34 = math.log %cst_15 : f32
    %cst_16 = arith.constant 5.000000e-01 : f32
    %35 = arith.mulf %cst_16, %34 : f32
    %36 = vector.broadcast %35 : f32 to vector<8x128xf32>
    %37 = arith.subf %33, %36 : vector<8x128xf32>
    %38 = arith.mulf %37, %28 : vector<8x128xf32>
    %cst_17 = arith.constant dense<0.000000e+00> : vector<8xf32>
    %39 = vector.multi_reduction <add>, %38, %cst_17 [1] : vector<8x128xf32> to vector<8xf32>
    %40 = vector.shape_cast %39 : vector<8xf32> to vector<8x1xf32>
    %c5_i32 = arith.constant 5 : i32
    %41 = vector.broadcast %c5_i32 : i32 to vector<8x128xi32>
    %42 = arith.cmpi eq, %24, %41 : vector<8x128xi32>
    %43 = vector.shape_cast %40 : vector<8x1xf32> to vector<8x1xf32>
    %44 = vector.broadcast %43 : vector<8x1xf32> to vector<8x128xf32>
    %45 = arith.select %42, %44, %23 : vector<8x128xi1>, vector<8x128xf32>
    %c0_18 = arith.constant 0 : index
    %c0_19 = arith.constant 0 : index
    %46 = vector.load %arg5[%c0_18, %c0_19] : memref<8x128xf32, #tpu.memory_space<vmem>>, vector<8x128xf32>
    tpu.vector_store %arg5[%c0_18, %c0_19], %45 {strides = array<i32>} : memref<8x128xf32, #tpu.memory_space<vmem>>, vector<8x128xf32>,
    return
  }
  func.func @transform_0(%arg0: i32) -> (i32, i32) {
    %c0_i32 = arith.constant 0 : i32
    %c0_i32_0 = arith.constant 0 : i32
    return %arg0, %c0_i32 : i32, i32
  }
  func.func @transform_1(%arg0: i32) -> (i32, i32) {
    %c0_i32 = arith.constant 0 : i32
    %c0_i32_0 = arith.constant 0 : i32
    return %arg0, %c0_i32 : i32, i32
  }
  func.func @transform_2(%arg0: i32) -> (i32, i32) {
    %c0_i32 = arith.constant 0 : i32
    %c0_i32_0 = arith.constant 0 : i32
    %c0_i32_1 = arith.constant 0 : i32
    return %c0_i32, %c0_i32_0 : i32, i32
  }
  func.func @transform_3(%arg0: i32) -> (i32, i32) {
    %c0_i32 = arith.constant 0 : i32
    %c0_i32_0 = arith.constant 0 : i32
    %c0_i32_1 = arith.constant 0 : i32
    return %c0_i32, %c0_i32_0 : i32, i32
  }
  func.func @transform_4(%arg0: i32) -> (i32, i32) {
    %c0_i32 = arith.constant 0 : i32
    %c0_i32_0 = arith.constant 0 : i32
    return %arg0, %c0_i32 : i32, i32
  }
}

</mosaic_0001>

<bundles_post_ra>
// kernel: tpu_custom_call.1
= control target key start
LH: loop header
LB: loop body
LE: loop exit
PB: predicated region body
PF: predicated region fallthrough
CT: control target
= control target key end

     0   :  { %9 = vsyncpa [#allocation3], 0  ;;  %s843_s0 = inlined_call_operand.hbm [shape: f32[8,128], index: 0, kind: input, shape index: {}]   ;;  %s844_s1 = inlined_call_operand.hbm [shape: f32[8,128], index: 1, kind: input, shape index: {}]   ;;  %s845_s2 = inlined_call_operand.hbm [shape: f32[384,128], index: 2, kind: input, shape index: {}]   ;;  %s846_s3 = inlined_call_operand.vmem [shape: f32[8,128], index: 3, kind: input, shape index: {}]   ;;  %s847_s4 = inlined_call_operand.hbm [shape: f32[8,128], index: 4, kind: output, shape index: {}]  }
   0x1   :  { %10 = vsyncpa [#allocation6], 0 }
   0x2   :  { %11 = vsyncpa [#allocation4], 0  ;;  %s718_s15 = smov [#allocation5]   ;;  %s719_s17 = smov [#allocation2]  }
   0x3   :  { %s28_s16 = sshll.u32 %s718_s15, 4  ;;  %s18_s18 = sshll.u32 %s719_s17, 4  ;;  %s29_s16 = int_to_ptr.vmem [resolvable:$true] %s28_s16  ;;  %s19_s18 = int_to_ptr.vmem [resolvable:$true] %s18_s18 }
   0x4   :  { %s624_s21 = scalar_lea.hbm %s844_s1, 128 }
   0x5   :  { %p625_p0 = scmp.ne.s32.totalorder %s844_s1, %s624_s21  ;;  %p628_p1 = scmp.lt.u32.totalorder %s624_s21, %s844_s1 }
   0x7   :  { %p630_p2 = pnand %p628_p1, %p625_p0 }
   0x9   :  { %633 = shalt.err (!%p630_p2)
}
   0xa   :  { %s634_s26 = scalar_lea.vmem %s29_s16, 128  ;;  %p639_p4 = scmp.lt.s32.totalorder %s29_s16, %s29_s16 }
   0xb   :  { %p635_p3 = scmp.ne.s32.totalorder %s29_s16, %s634_s26  ;;  %p640_p5 = scmp.lt.s32.totalorder %s634_s26, %s634_s26 }
   0xd   :  { %p641_p6 = por %p640_p5, %p639_p4 }
   0xf   :  { %p642_p7 = pnand %p641_p6, %p635_p3 }
  0x11   :  { %645 = shalt.err (!%p642_p7)
}
  0x12   :  { %31 = dma.hbm_to_vmem [thread:$0]  %s844_s1, 128, %s29_s16, [#allocation6]  }
  0x13   :  { %s646_s5 = scalar_lea.hbm %s843_s0, 128 }
  0x14   :  { %p647_p8 = scmp.ne.s32.totalorder %s843_s0, %s646_s5  ;;  %p650_p9 = scmp.lt.u32.totalorder %s646_s5, %s843_s0 }
  0x16   :  { %p652_p10 = pnand %p650_p9, %p647_p8 }
  0x18   :  { %655 = shalt.err (!%p652_p10)
}
  0x19   :  { %s656_s10 = scalar_lea.vmem %s19_s18, 128  ;;  %p661_p12 = scmp.lt.s32.totalorder %s19_s18, %s19_s18 }
  0x1a   :  { %p657_p11 = scmp.ne.s32.totalorder %s19_s18, %s656_s10  ;;  %p662_p13 = scmp.lt.s32.totalorder %s656_s10, %s656_s10 }
  0x1c   :  { %p663_p0 = por %p662_p13, %p661_p12 }
  0x1e   :  { %p664_p1 = pnand %p663_p0, %p657_p11 }
  0x20   :  { %667 = shalt.err (!%p664_p1)
}
  0x21   :  { %21 = dma.hbm_to_vmem [thread:$0]  %s843_s0, 128, %s19_s18, [#allocation3]  }
  0x22   :  { %s720_s12 = smov [#allocation7]   ;;  %s668_s16 = scalar_lea.hbm %s845_s2, 6144 }
  0x23   :  { %s37_s13 = sshll.u32 %s720_s12, 4  ;;  %p669_p2 = scmp.ne.s32.totalorder %s845_s2, %s668_s16  ;;  %s38_s13 = int_to_ptr.vmem [resolvable:$true] %s37_s13 }
  0x24   :  { %p672_p3 = scmp.lt.u32.totalorder %s668_s16, %s845_s2 }
  0x26   :  { %p674_p4 = pnand %p672_p3, %p669_p2 }
  0x28   :  { %677 = shalt.err (!%p674_p4)
}
  0x29   :  { %s678_s22 = scalar_lea.vmem %s38_s13, 6144  ;;  %p683_p6 = scmp.lt.s32.totalorder %s38_s13, %s38_s13 }
  0x2a   :  { %p679_p5 = scmp.ne.s32.totalorder %s38_s13, %s678_s22  ;;  %p684_p7 = scmp.lt.s32.totalorder %s678_s22, %s678_s22 }
  0x2c   :  { %p685_p8 = por %p684_p7, %p683_p6 }
  0x2e   :  { %p686_p9 = pnand %p685_p8, %p679_p5 }
  0x30   :  { %689 = shalt.err (!%p686_p9)
}
  0x31   :  { %s721_s0 = smov 128   ;;  %s722_s18 = smov 8  }
  0x32   :  { %43 = dma.hbm_to_vmem [thread:$0]  %s845_s2, 6144, %s38_s13, [#allocation6], %s721_s0, %s721_s0, %s722_s18  }
  0x33   :  { %712 = dma.done.wait [#allocation3], 128  }
  0x34   :  { %713 = vsyncadd [#allocation3], 4294967168 }
  0x35   :  { %714 = dma.done.wait [#allocation6], 6272  }
  0x36   :  { %715 = vsyncadd [#allocation6], 4294961024  ;;  %v723_v0 = vmov 0.0|0.0   ;;  %vm724_vm0 = vmmov 0   ;;  %v725_v1 = vmov 0.0   ;;  %v56_v2 = vld [vmem:[#allocation7] sm:$0xff] }
  0x37   :  { %537 = vmatprep.subr.bf16.mxu0 %v723_v0  ;;  %464 = vmatprep.mubr.msk.f32.mxu0 %vm724_vm0, %v725_v1  ;;  %v57_v3 = vld [vmem:[#allocation7 + $0x8] sm:$0xff]  ;;  %v58_v4 = vld [vmem:[#allocation7 + $0x10] sm:$0xff]  ;;  %v59_v6 = vld [vmem:[#allocation7 + $0x18] sm:$0xff]  ;;  %s726_s6 = smov [#allocation8]  }
  0x38   :  { %561 = vmatprep.subr.bf16.mxu1 %v723_v0  ;;  %499 = vmatprep.mubr.msk.f32.mxu1 %vm724_vm0, %v725_v1  ;;  %v538_v5 = vpack.c.bf16 %v57_v3, %v56_v2  ;;  %v541_v7 = vpack.c.bf16 %v59_v6, %v58_v4  ;;  %v60_v8 = vld [vmem:[#allocation7 + $0x20] sm:$0xff]  ;;  %v61_v9 = vld [vmem:[#allocation7 + $0x28] sm:$0xff]  ;;  %v74_v12 = vld [vmem:[#allocation7 + $0x90] sm:$0xff]  ;;  %s366_s7 = sshll.u32 %s726_s6, 4  ;;  %s367_s7 = int_to_ptr.vmem [resolvable:$true] %s366_s7 }
  0x39   :  { %v72_v10 = vld [vmem:[#allocation7 + $0x80] sm:$0xff]  ;;  %v73_v11 = vld [vmem:[#allocation7 + $0x88] sm:$0xff]  ;;  %v75_v13 = vld [vmem:[#allocation7 + $0x98] sm:$0xff]  ;;  %v544_v14 = vpack.c.bf16 %v61_v9, %v60_v8  ;;  %s690_s8 = scalar_lea.vmem %s367_s7, 128  ;;  %p695_p11 = scmp.lt.s32.totalorder %s367_s7, %s367_s7 }
  0x3a   :  { %539 = vmatpush3.bf16.msra.mxu0 %v538_v5  ;;  %v562_v15 = vpack.c.bf16 %v73_v11, %v72_v10  ;;  %v62_v16 = vld [vmem:[#allocation7 + $0x30] sm:$0xff]  ;;  %v63_v17 = vld [vmem:[#allocation7 + $0x38] sm:$0xff]  ;;  %v565_v18 = vpack.c.bf16 %v75_v13, %v74_v12  ;;  %v76_v19 = vld [vmem:[#allocation7 + $0xa0] sm:$0xff]  ;;  %p691_p10 = scmp.ne.s32.totalorder %s367_s7, %s690_s8  ;;  %p696_p12 = scmp.lt.s32.totalorder %s690_s8, %s690_s8 }
  0x3b   :  { %540 = vmatprep.subr.bf16.mxu0 %v723_v0  ;;  %v77_v20 = vld [vmem:[#allocation7 + $0xa8] sm:$0xff]  ;;  %v547_v21 = vpack.c.bf16 %v63_v17, %v62_v16  ;;  %v64_v22 = vld [vmem:[#allocation7 + $0x40] sm:$0xff]  ;;  %v78_v25 = vld [vmem:[#allocation7 + $0xb0] sm:$0xff] }
  0x3c   :  { %563 = vmatpush3.bf16.msra.mxu1 %v562_v15  ;;  %v65_v23 = vld [vmem:[#allocation7 + $0x48] sm:$0xff]  ;;  %v568_v24 = vpack.c.bf16 %v77_v20, %v76_v19  ;;  %v79_v26 = vld [vmem:[#allocation7 + $0xb8] sm:$0xff]  ;;  %v66_v28 = vld [vmem:[#allocation7 + $0x50] sm:$0xff]  ;;  %v335_v19 = vlaneseq  ;;  %p697_p13 = por %p696_p12, %p695_p11 }
  0x3d   :  { %564 = vmatprep.subr.bf16.mxu1 %v723_v0  ;;  %v550_v27 = vpack.c.bf16 %v65_v23, %v64_v22  ;;  %v67_v29 = vld [vmem:[#allocation7 + $0x58] sm:$0xff]  ;;  %v571_v30 = vpack.c.bf16 %v79_v26, %v78_v25  ;;  %v80_v31 = vld [vmem:[#allocation7 + $0xc0] sm:$0xff]  ;;  %v81_v32 = vld [vmem:[#allocation7 + $0xc8] sm:$0xff] }
  0x3e   :  { %542 = vmatpush3.bf16.msra.mxu0 %v541_v7  ;;  %v553_v33 = vpack.c.bf16 %v67_v29, %v66_v28  ;;  %v68_v34 = vld [vmem:[#allocation7 + $0x60] sm:$0xff]  ;;  %v69_v35 = vld [vmem:[#allocation7 + $0x68] sm:$0xff]  ;;  %v574_v36 = vpack.c.bf16 %v81_v32, %v80_v31  ;;  %v70_v38 = vld [vmem:[#allocation7 + $0x70] sm:$0xff]  ;;  %v342_v22 = vand.u32 127, %v335_v19  ;;  %p698_p0 = pnand %p697_p13, %p691_p10 }
  0x3f   :  { %543 = vmatprep.subr.bf16.mxu0 %v723_v0  ;;  %v556_v37 = vpack.c.bf16 %v69_v35, %v68_v34  ;;  %v71_v39 = vld [vmem:[#allocation7 + $0x78] sm:$0xff]  ;;  %v55_v41 = vld [vmem:[#allocation2] sm:$0xff]  ;;  %v84_v45 = vld [vmem:[#allocation7 + $0xe0] sm:$0xff] }
  0x40   :  { %566 = vmatpush3.bf16.msra.mxu1 %v565_v18  ;;  %v559_v40 = vpack.c.bf16 %v71_v39, %v70_v38  ;;  %v82_v42 = vld [vmem:[#allocation7 + $0xd0] sm:$0xff]  ;;  %v83_v43 = vld [vmem:[#allocation7 + $0xd8] sm:$0xff]  ;;  %v85_v46 = vld [vmem:[#allocation7 + $0xe8] sm:$0xff]  ;;  %vm343_vm1 = vcmp.lt.s32.totalorder %v342_v22, 4  ;;  %vm357_vm2 = vcmp.eq.s32.totalorder %v342_v22, 5 }
  0x41   :  { %567 = vmatprep.subr.bf16.mxu1 %v723_v0  ;;  %v577_v44 = vpack.c.bf16 %v83_v43, %v82_v42  ;;  %v580_v47 = vpack.c.bf16 %v85_v46, %v84_v45  ;;  %v86_v48 = vld [vmem:[#allocation7 + $0xf0] sm:$0xff]  ;;  %v87_v49 = vld [vmem:[#allocation7 + $0xf8] sm:$0xff]  ;;  %v88_v51 = vld [vmem:[#allocation7 + $0x100] sm:$0xff]  ;;  %v379_v28 = vsel %vm343_vm1, 1.0, %v725_v1 }
  0x42   :  { %545 = vmatpush3.bf16.msra.mxu0 %v544_v14  ;;  %v583_v50 = vpack.c.bf16 %v87_v49, %v86_v48  ;;  %v89_v52 = vld [vmem:[#allocation7 + $0x108] sm:$0xff]  ;;  %v90_v53 = vld [vmem:[#allocation7 + $0x110] sm:$0xff]  ;;  %v91_v55 = vld [vmem:[#allocation7 + $0x118] sm:$0xff] }
  0x43   :  { %546 = vmatprep.subr.bf16.mxu0 %v723_v0  ;;  %v586_v54 = vpack.c.bf16 %v89_v52, %v88_v51  ;;  %v589_v56 = vpack.c.bf16 %v91_v55, %v90_v53  ;;  %v92_v57 = vld [vmem:[#allocation7 + $0x120] sm:$0xff]  ;;  %v93_v58 = vld [vmem:[#allocation7 + $0x128] sm:$0xff]  ;;  %v94_v60 = vld [vmem:[#allocation7 + $0x130] sm:$0xff] }
  0x44   :  { %569 = vmatpush3.bf16.msra.mxu1 %v568_v24  ;;  %v592_v59 = vpack.c.bf16 %v93_v58, %v92_v57  ;;  %v95_v61 = vld [vmem:[#allocation7 + $0x138] sm:$0xff]  ;;  %v96_v63 = vld [vmem:[#allocation7 + $0x140] sm:$0xff]  ;;  %v97_v2 = vld [vmem:[#allocation7 + $0x148] sm:$0xff] }
  0x45   :  { %570 = vmatprep.subr.bf16.mxu1 %v723_v0  ;;  %v595_v62 = vpack.c.bf16 %v95_v61, %v94_v60  ;;  %v598_v3 = vpack.c.bf16 %v97_v2, %v96_v63  ;;  %v376_v4 = vld [vmem:[%s846_s3] ss:$0 sm:$0xff]  ;;  %v99_v10 = vld [vmem:[#allocation7 + $0x158] sm:$0xff]  ;;  %v100_v12 = vld [vmem:[#allocation7 + $0x160] sm:$0xff] }
  0x46   :  { %548 = vmatpush3.bf16.msra.mxu0 %v547_v21  ;;  %v98_v9 = vld [vmem:[#allocation7 + $0x150] sm:$0xff]  ;;  %v101_v13 = vld [vmem:[#allocation7 + $0x168] sm:$0xff]  ;;  %v103_v16 = vld [vmem:[#allocation7 + $0x178] sm:$0xff]  ;;  %v336_v21 = vshrl.u32 %v335_v19, 7 }
  0x47   :  { %549 = vmatprep.subr.bf16.mxu0 %v723_v0  ;;  %v601_v11 = vpack.c.bf16 %v99_v10, %v98_v9  ;;  %v604_v14 = vpack.c.bf16 %v101_v13, %v100_v12  ;;  %v102_v15 = vld [vmem:[#allocation7 + $0x170] sm:$0xff]  ;;  %v332_v18 = vld [vmem:[#allocation5] sm:$0xff] }
  0x48   :  { %572 = vmatpush3.bf16.msra.mxu1 %v571_v30  ;;  %v607_v17 = vpack.c.bf16 %v103_v16, %v102_v15  ;;  %v346_v20 = vmul.f32 -0.5, %v332_v18  ;;  %v107_v23 = vld [vmem:[%s846_s3 + $0x3] sm:$0x1]  ;;  %v337_v24 = vsub.s32 0, %v336_v21 }
  0x49   :  { %573 = vmatprep.subr.bf16.mxu1 %v723_v0  ;;  %v333_v35 = vmul.f32 1.442695, %v107_v23 }
  0x4a   :  { %551 = vmatpush3.bf16.msra.mxu0 %v550_v27  ;;  %v347_v25 = vmul.f32 %v346_v20, %v332_v18  ;;  %v351_v26 = vrot.slane %v107_v23, %v337_v24 }
  0x4b   :  { %552 = vmatprep.subr.bf16.mxu0 %v723_v0 }
  0x4c   :  { %575 = vmatpush3.bf16.msra.mxu1 %v574_v36  ;;  %v352_v27 = vsub.f32 %v347_v25, %v351_v26 }
  0x4d   :  { %576 = vmatprep.subr.bf16.mxu1 %v723_v0 }
  0x4e   :  { %554 = vmatpush3.bf16.msra.mxu0 %v553_v33  ;;  %v380_v29 = vadd.f32 -0.9189385, %v352_v27 }
  0x4f   :  { %555 = vmatprep.subr.bf16.mxu0 %v723_v0 }
  0x50   :  { %578 = vmatpush3.bf16.msra.mxu1 %v577_v44  ;;  %v354_v30 = vmul.f32 %v380_v29, %v379_v28 }
  0x51   :  { %579 = vmatprep.subr.bf16.mxu1 %v723_v0 }
  0x52   :  { %557 = vmatpush3.bf16.msra.mxu0 %v556_v37  ;;  %355 = vadd.xlane.f32.xlu0 %v354_v30 }
  0x53   :  { %558 = vmatprep.subr.bf16.mxu0 %v723_v0 }
  0x54   :  { %581 = vmatpush3.bf16.msra.mxu1 %v580_v47 }
  0x55   :  { %582 = vmatprep.subr.bf16.mxu1 %v723_v0 }
  0x56   :  { %560 = vmatpush3.bf16.msra.mxu0 %v559_v40 }
  0x57   :  { %585 = vmatprep.subr.bf16.mxu0 %v723_v0 }
  0x58   :  { %584 = vmatpush3.bf16.msra.mxu1 %v583_v50 }
  0x59   :  { %465 = vmatmul.mubr.f32.vlgmr.msra.gmra.mrb[0].mxu0 %v55_v41 }
  0x5a   :  { %534 = vmatprep.mubr.msk.f32.mxu0 %vm724_vm0, %v725_v1  ;;  %587 = vmatpush3.bf16.msra.mxu0 %v586_v54  ;;  %v378_v1 = vld [vmem:[%s846_s3 + $0x2] ss:$0 sm:$0xff] }
  0x5b   :  { %588 = vmatprep.subr.bf16.mxu0 %v723_v0 }
  0x5e   :  { %590 = vmatpush3.bf16.msra.mxu0 %v589_v56 }
  0x5f   :  { %591 = vmatprep.subr.bf16.mxu0 %v723_v0 }
  0x62   :  { %593 = vmatpush3.bf16.msra.mxu0 %v592_v59 }
  0x63   :  { %594 = vmatprep.subr.bf16.mxu0 %v723_v0 }
  0x66   :  { %596 = vmatpush3.bf16.msra.mxu0 %v595_v62 }
  0x67   :  { %597 = vmatprep.subr.bf16.mxu0 %v723_v0 }
  0x6a   :  { %599 = vmatpush3.bf16.msra.mxu0 %v598_v3 }
  0x6b   :  { %600 = vmatprep.subr.bf16.mxu0 %v723_v0 }
  0x6e   :  { %602 = vmatpush3.bf16.msra.mxu0 %v601_v11 }
  0x6f   :  { %603 = vmatprep.subr.bf16.mxu0 %v723_v0 }
  0x72   :  { %605 = vmatpush3.bf16.msra.mxu0 %v604_v14 }
  0x73   :  { %606 = vmatprep.subr.bf16.mxu0 %v723_v0  ;;  %v377_v0 = vld [vmem:[%s846_s3 + $0x1] ss:$0 sm:$0xff] }
  0x76   :  { %608 = vmatpush3.bf16.msra.mxu0 %v607_v17 }
  0xdf   :  { %v356_v42 = vpop.xlane.xlu0 %355 }
 0x12c   :  { %v178_v5 = vpop.f32.mrb[0].mxu0 }
 0x12d   :  { %v179_v6 = vadd.f32 %v376_v4, %v178_v5  ;;  %v466_v7 = vpop.f32.mrb[1].mxu0 }
 0x12f   :  { %618 = vtanh.f32 %v179_v6 }
 0x139   :  { %v619_v8 = vpop.eup %618 }
 0x13a   :  { %500 = vmatmul.mubr.f32.vlgmr.msra.gmra.mrb[0].mxu1 %v619_v8 }
 0x20d   :  { %v253_v31 = vpop.f32.mrb[0].mxu1 }
 0x20e   :  { %v254_v32 = vadd.f32 %v377_v0, %v253_v31  ;;  %v501_v33 = vpop.f32.mrb[1].mxu1 }
 0x210   :  { %620 = vtanh.f32 %v254_v32 }
 0x211   :  { %622 = vpow2.f32 %v333_v35 }
 0x21a   :  { %v621_v34 = vpop.eup %620 }
 0x21b   :  { %535 = vmatmul.mubr.f32.vlgmr.msra.gmra.mrb[2].mxu0 %v621_v34  ;;  %v623_v36 = vpop.eup %622 }
 0x21c   :  { %v338_v37 = vrot.slane %v623_v36, %v337_v24 }
 0x21e   :  { %v339_v38 = vmul.f32 %v338_v37, %v332_v18 }
 0x2ee   :  { %v328_v39 = vpop.f32.mrb[2].mxu0 }
 0x2ef   :  { %v329_v40 = vadd.f32 %v378_v1, %v328_v39  ;;  %v536_v41 = vpop.f32.mrb[3].mxu0 }
 0x2f1   :  { %v340_v43 = vadd.f32 %v339_v38, %v329_v40 }
 0x2f3   :  { %v358_v44 = vsel %vm357_vm2, %v356_v42, %v340_v43 }
 0x2f4   :  { %359 = vst [vmem:[#allocation8] sm:$0xff] %v358_v44 }
 0x2f5   :  { %701 = shalt.err (!%p698_p0)
}
 0x2f6   :  { %s702_s10 = scalar_lea.hbm %s847_s4, 128 }
 0x2f7   :  { %p703_p1 = scmp.ne.s32.totalorder %s847_s4, %s702_s10  ;;  %p706_p2 = scmp.lt.u32.totalorder %s702_s10, %s847_s4 }
 0x2f9   :  { %p708_p3 = pnand %p706_p2, %p703_p1 }
 0x2fb   :  { %711 = shalt.err (!%p708_p3)
}
 0x2fc   :  { %369 = dma.vmem_to_hbm [thread:$0]  %s367_s7, 128, %s847_s4, [#allocation4]  }
 0x2fd   :  { %716 = dma.done.wait [#allocation4], 128  }
 0x2fe   :  { %717 = vsyncadd [#allocation4], 4294967168 }
 0x2ff   :  { %373 = vsyncpa [#allocation3], 1 }
 0x300   :  { %374 = vsyncpa [#allocation6], 1 }
 0x301   :  { %375 = vsyncpa [#allocation4], 1 }

</bundles_post_ra>
